<compile_context>
chip_gen: v5e
topology: v5e:2x2
jax: 0.10.0
libtpu: 0.0.40
codegen_flags: <defaults>
</compile_context>

<pallas_src>
import functools

import jax
import jax.numpy as jnp
from jax.experimental import pallas as pl
from jax.experimental.pallas import tpu as pltpu

IN_DIM = 28 * 28   # 784
HID = 64
OUT = 3
OUT_PAD = 128      # lane-dense output width (zero padded, sliced off in wrapper)


def _round_up(a, m):
    return ((a + m - 1) // m) * m


def encoder_kernel(x_ref, w1_ref, b1_ref, w2_ref, b2_ref, o_ref):
    # x_ref: (TB, 784) f32, w1_ref: (784, 64) bf16, b1_ref: (1, 64) f32,
    # w2_ref: (64, 128) f32, b2_ref: (1, 128) f32, o_ref: (TB, 128) f32.
    # bf16 operands -> single-pass MXU; accumulate in f32.
    x_bf = x_ref[...].astype(jnp.bfloat16)
    h = jnp.dot(x_bf, w1_ref[...], preferred_element_type=jnp.float32)
    h = jnp.maximum(h + b1_ref[...], 0.0)                      # ReLU (b1_eff folds the +1)
    y = jnp.dot(h, w2_ref[...], preferred_element_type=jnp.float32) + b2_ref[...]
    o_ref[...] = y.astype(o_ref.dtype)


def prepare_encoder_params(w1_t, b1, w2_t, b2):
    """One-time weight prep (call once; do not re-run per forward).

    w1_t: (784, 64), b1: (1, 64), w2_t: (64, 3), b2: (1, 3) — all f32.
    """
    # Fold the module's "+1" into the first-layer bias (exact, in f32):
    #   (x + 1) @ W1 + b1 == x @ W1 + (b1 + colsum(W1)).
    b1_eff = (b1.reshape(1, HID).astype(jnp.float32)
              + jnp.sum(w1_t.astype(jnp.float32), axis=0, keepdims=True))
    w1_bf = w1_t.astype(jnp.bfloat16)                           # bf16 MXU operand
    w2_p = jnp.pad(w2_t.astype(jnp.float32), ((0, 0), (0, OUT_PAD - OUT)))
    b2_p = jnp.pad(b2.reshape(1, OUT).astype(jnp.float32), ((0, 0), (0, OUT_PAD - OUT)))
    return w1_bf, b1_eff, w2_p, b2_p


@functools.partial(jax.jit, static_argnames=("tb",))
def encoder_forward(x, w1_bf, b1_eff, w2_p, b2_p, *, tb=2048):
    """x: (B, 784) f32; params from prepare_encoder_params. Returns (B, 3) f32."""
    B = x.shape[0]

    # Tile policy: no padding / copy of x.
    #  - tb_eff is a multiple of 8 and <= tb (default 2048 amortizes the ~0.35us
    #    per-grid-step pipeline overhead).
    #  - when B >= 16 we force >= 2 tiles so dimension_semantics=("parallel",)
    #    actually shards across both v7x TensorCores (the extra grid step is
    #    negligible on single-TC v5e / v6e).
    #  - the ragged tail tile is handled by Pallas' masked partial-block DMAs
    #    (OOB rows: garbage on read, discarded on store; rows are independent).
    min_tiles = 2 if B >= 16 else 1
    n_tiles = max(pl.cdiv(B, tb), min_tiles)
    tb_eff = _round_up(pl.cdiv(B, n_tiles), 8)
    grid = (pl.cdiv(B, tb_eff),)

    # Advisory cost (no padded work counted any more).
    weight_bytes = IN_DIM * HID * 2 + HID * 4 + HID * OUT_PAD * 4 + OUT_PAD * 4
    cost = pl.CostEstimate(
        flops=2 * B * IN_DIM * HID + 2 * B * HID * OUT_PAD,
        transcendentals=0,
        bytes_accessed=B * IN_DIM * 4 + B * OUT_PAD * 4 + weight_bytes,
    )

    out = pl.pallas_call(
        encoder_kernel,
        out_shape=jax.ShapeDtypeStruct((B, OUT_PAD), jnp.float32),
        grid_spec=pltpu.PrefetchScalarGridSpec(
            num_scalar_prefetch=0,
            grid=grid,
            in_specs=[
                pl.BlockSpec((tb_eff, IN_DIM), lambda i: (i, 0)),   # x tile (streamed f32)
                pl.BlockSpec((IN_DIM, HID), lambda i: (0, 0)),      # W1^T bf16 (resident)
                pl.BlockSpec((1, HID), lambda i: (0, 0)),           # b1_eff (resident)
                pl.BlockSpec((HID, OUT_PAD), lambda i: (0, 0)),     # W2^T padded (resident)
                pl.BlockSpec((1, OUT_PAD), lambda i: (0, 0)),       # b2 padded (resident)
            ],
            out_specs=pl.BlockSpec((tb_eff, OUT_PAD), lambda i: (i, 0)),
        ),
        compiler_params=pltpu.CompilerParams(
            dimension_semantics=("parallel",),
            # VMEM budget at tb_eff=2048 (x lane-padded 784->896 in VMEM):
            #   x 2*7.0MiB + out 2*1MiB + weights ~0.5MiB + temporaries ~6MiB
            #   ~= 22 MiB < 32 MiB scoped limit (fits v7x's 64 MiB physical VMEM).
            vmem_limit_bytes=32 << 20,
        ),
        cost_estimate=cost,
    )(x, w1_bf, b1_eff, w2_p, b2_p)

    # Strip the lane padding on the 3-wide output (column slice only; no row
    # padding exists). TODO(synk): if the consumer can take the 128-wide block,
    # return `out` directly and fuse the slice downstream to skip this pass.
    return out[:, :OUT]


def reference_forward(x, w1_t, b1, w2_t, b2):
    h = jnp.maximum((x + 1.0) @ w1_t + b1, 0.0)
    return h @ w2_t + b2


if __name__ == "__main__":
    key = jax.random.PRNGKey(0)
    kx, k1, k2, k3, k4 = jax.random.split(key, 5)

    # Deterministic params (PyTorch Linear stores W as (out, in); kernel uses (in, out)).
    w1 = jax.random.normal(k1, (HID, IN_DIM), dtype=jnp.float32) * 0.02  # (64, 784)
    b1 = jax.random.normal(k2, (1, HID), dtype=jnp.float32) * 0.01       # (1, 64)
    w2 = jax.random.normal(k3, (OUT, HID), dtype=jnp.float32) * 0.02     # (3, 64)
    b2 = jax.random.normal(k4, (1, OUT), dtype=jnp.float32) * 0.01       # (1, 3)

    w1_t = w1.T  # (784, 64)
    w2_t = w2.T  # (64, 3)

    params = prepare_encoder_params(w1_t, b1, w2_t, b2)
    params = jax.block_until_ready(params)

    ok = True
    # Tiny batch, ragged batch, and a multi-tile ragged batch (exercises the
    # partial-block / megacore-split paths).
    for B in (2, 37, 260):
        xb = jax.random.normal(jax.random.fold_in(kx, B), (B, IN_DIM), dtype=jnp.float32)

        y = encoder_forward(xb, *params)
        y = jax.block_until_ready(y)

        y_ref = reference_forward(xb, w1_t, b1, w2_t, b2)
        assert y.shape == (B, OUT)
        # bf16 first-layer operands (f32 accumulate) -> loosened tolerance vs f32 ref.
        ok = ok and bool(jnp.allclose(y, y_ref, atol=1e-2, rtol=1e-2))

    assert ok, "mismatch vs reference"
    print("KERNEL_OK")
</pallas_src>

<mosaic_0001>
module attributes {stable_mosaic.version = 11 : i64} {
  func.func @encoder_kernel(%arg0: i32, %arg1: memref<8x784xf32, #tpu.memory_space<vmem>>, %arg2: memref<784x64xbf16, #tpu.memory_space<vmem>>, %arg3: memref<1x64xf32, #tpu.memory_space<vmem>>, %arg4: memref<64x128xf32, #tpu.memory_space<vmem>>, %arg5: memref<1x128xf32, #tpu.memory_space<vmem>>, %arg6: memref<8x128xf32, #tpu.memory_space<vmem>>) attributes {dimension_semantics = [#tpu.dimension_semantics<parallel>], iteration_bounds = array<i64: 1>, scalar_prefetch = 0 : i64, scratch_operands = 0 : i64, tpu.core_type = #tpu.core_type<tc>, window_params = [{transform_indices = @transform_0, window_bounds = array<i64: 8, 784>}, {pipeline_mode = #tpu.pipeline_mode<synchronous>, transform_indices = @transform_1, window_bounds = array<i64: 784, 64>}, {pipeline_mode = #tpu.pipeline_mode<synchronous>, transform_indices = @transform_2, window_bounds = array<i64: 1, 64>}, {pipeline_mode = #tpu.pipeline_mode<synchronous>, transform_indices = @transform_3, window_bounds = array<i64: 64, 128>}, {pipeline_mode = #tpu.pipeline_mode<synchronous>, transform_indices = @transform_4, window_bounds = array<i64: 1, 128>}, {transform_indices = @transform_5, window_bounds = array<i64: 8, 128>}]} {
    %c0 = arith.constant 0 : index
    %c0_0 = arith.constant 0 : index
    %0 = vector.load %arg1[%c0, %c0_0] : memref<8x784xf32, #tpu.memory_space<vmem>>, vector<8x784xf32>
    %1 = arith.truncf %0 : vector<8x784xf32> to vector<8x784xbf16>
    %c0_1 = arith.constant 0 : index
    %c0_2 = arith.constant 0 : index
    %2 = vector.load %arg2[%c0_1, %c0_2] : memref<784x64xbf16, #tpu.memory_space<vmem>>, vector<784x64xbf16>
    %cst = arith.constant dense<0.000000e+00> : vector<8x64xf32>
    %3 = tpu.matmul %1, %2, %cst {dimension_numbers = #tpu.dot_dimension_numbers<[1], [0], [0], [1], [0, 0, 1, 1], [], []>} : vector<8x784xbf16>, vector<784x64xbf16>, vector<8x64xf32> -> vector<8x64xf32>
    %c0_3 = arith.constant 0 : index
    %c0_4 = arith.constant 0 : index
    %4 = vector.load %arg3[%c0_3, %c0_4] : memref<1x64xf32, #tpu.memory_space<vmem>>, vector<1x64xf32>
    %5 = vector.broadcast %4 : vector<1x64xf32> to vector<8x64xf32>
    %6 = arith.addf %3, %5 : vector<8x64xf32>
    %cst_5 = arith.constant 0.000000e+00 : f32
    %7 = vector.broadcast %cst_5 : f32 to vector<8x64xf32>
    %8 = arith.maximumf %6, %7 : vector<8x64xf32>
    %c0_6 = arith.constant 0 : index
    %c0_7 = arith.constant 0 : index
    %9 = vector.load %arg4[%c0_6, %c0_7] : memref<64x128xf32, #tpu.memory_space<vmem>>, vector<64x128xf32>
    %cst_8 = arith.constant dense<0.000000e+00> : vector<8x128xf32>
    %10 = tpu.matmul %8, %9, %cst_8 {dimension_numbers = #tpu.dot_dimension_numbers<[1], [0], [0], [1], [0, 0, 1, 1], [], []>} : vector<8x64xf32>, vector<64x128xf32>, vector<8x128xf32> -> vector<8x128xf32>
    %c0_9 = arith.constant 0 : index
    %c0_10 = arith.constant 0 : index
    %11 = vector.load %arg5[%c0_9, %c0_10] : memref<1x128xf32, #tpu.memory_space<vmem>>, vector<1x128xf32>
    %12 = vector.broadcast %11 : vector<1x128xf32> to vector<8x128xf32>
    %13 = arith.addf %10, %12 : vector<8x128xf32>
    %c0_11 = arith.constant 0 : index
    %c0_12 = arith.constant 0 : index
    %14 = vector.load %arg6[%c0_11, %c0_12] : memref<8x128xf32, #tpu.memory_space<vmem>>, vector<8x128xf32>
    tpu.vector_store %arg6[%c0_11, %c0_12], %13 {strides = array<i32>} : memref<8x128xf32, #tpu.memory_space<vmem>>, vector<8x128xf32>,
    return
  }
  func.func @transform_0(%arg0: i32) -> (i32, i32) {
    %c0_i32 = arith.constant 0 : i32
    %c0_i32_0 = arith.constant 0 : i32
    return %arg0, %c0_i32 : i32, i32
  }
  func.func @transform_1(%arg0: i32) -> (i32, i32) {
    %c0_i32 = arith.constant 0 : i32
    %c0_i32_0 = arith.constant 0 : i32
    %c0_i32_1 = arith.constant 0 : i32
    return %c0_i32, %c0_i32_0 : i32, i32
  }
  func.func @transform_2(%arg0: i32) -> (i32, i32) {
    %c0_i32 = arith.constant 0 : i32
    %c0_i32_0 = arith.constant 0 : i32
    %c0_i32_1 = arith.constant 0 : i32
    return %c0_i32, %c0_i32_0 : i32, i32
  }
  func.func @transform_3(%arg0: i32) -> (i32, i32) {
    %c0_i32 = arith.constant 0 : i32
    %c0_i32_0 = arith.constant 0 : i32
    %c0_i32_1 = arith.constant 0 : i32
    return %c0_i32, %c0_i32_0 : i32, i32
  }
  func.func @transform_4(%arg0: i32) -> (i32, i32) {
    %c0_i32 = arith.constant 0 : i32
    %c0_i32_0 = arith.constant 0 : i32
    %c0_i32_1 = arith.constant 0 : i32
    return %c0_i32, %c0_i32_0 : i32, i32
  }
  func.func @transform_5(%arg0: i32) -> (i32, i32) {
    %c0_i32 = arith.constant 0 : i32
    %c0_i32_0 = arith.constant 0 : i32
    return %arg0, %c0_i32 : i32, i32
  }
}

</mosaic_0001>

<bundles_post_ra>
// kernel: encoder_forward.1
= control target key start
LH: loop header
LB: loop body
LE: loop exit
PB: predicated region body
PF: predicated region fallthrough
CT: control target
= control target key end

     0   :  { %10 = vsyncpa [#allocation3], 0  ;;  %vm470_vm0 = vcmask 130048   ;;  %vm578_vm1 = vcmask 523264   ;;  %s1136_s0 = inlined_call_operand.vmem [shape: f32[2,784], index: 0, kind: input, shape index: {}]   ;;  %s1137_s1 = inlined_call_operand.vmem [shape: bf16[784,64], index: 1, kind: input, shape index: {}]   ;;  %s1138_s2 = inlined_call_operand.vmem [shape: f32[1,64], index: 2, kind: input, shape index: {}]   ;;  %s1139_s3 = inlined_call_operand.vmem [shape: f32[64,128], index: 3, kind: input, shape index: {}]   ;;  %s1140_s4 = inlined_call_operand.vmem [shape: f32[1,128], index: 4, kind: input, shape index: {}]   ;;  %s1141_s5 = inlined_call_operand.hbm [shape: f32[2,128], index: 5, kind: output, shape index: {}]  }
   0x1   :  { %v826_v0 = vld [vmem:[%s1137_s1 + $0x38] sm:$0xff]  ;;  %v825_v3 = vld [vmem:[%s1137_s1 + $0x30] sm:$0xff]  ;;  %v824_v7 = vld [vmem:[%s1137_s1 + $0x28] sm:$0xff] }
   0x2   :  { %v834_v1 = vld [vmem:[%s1137_s1 + $0x78] sm:$0xff]  ;;  %474 = vmatpush.bf16.msra.mxu0 %v826_v0  ;;  %v833_v4 = vld [vmem:[%s1137_s1 + $0x70] sm:$0xff]  ;;  %v832_v8 = vld [vmem:[%s1137_s1 + $0x68] sm:$0xff] }
   0x3   :  { %v842_v2 = vld [vmem:[%s1137_s1 + $0xb8] sm:$0xff]  ;;  %487 = vmatpush.bf16.msra.mxu1 %v834_v1  ;;  %v841_v5 = vld [vmem:[%s1137_s1 + $0xb0] sm:$0xff]  ;;  %v840_v9 = vld [vmem:[%s1137_s1 + $0xa8] sm:$0xff] }
   0x4   :  { %500 = vmatpush.bf16.msra.mxu2 %v842_v2  ;;  %v850_v6 = vld [vmem:[%s1137_s1 + $0xf8] sm:$0xff]  ;;  %v849_v10 = vld [vmem:[%s1137_s1 + $0xf0] sm:$0xff]  ;;  %v823_v11 = vld [vmem:[%s1137_s1 + $0x20] sm:$0xff] }
   0x5   :  { %513 = vmatpush.bf16.msra.mxu3 %v850_v6  ;;  %v831_v12 = vld [vmem:[%s1137_s1 + $0x60] sm:$0xff]  ;;  %v848_v14 = vld [vmem:[%s1137_s1 + $0xe8] sm:$0xff]  ;;  %v822_v19 = vld [vmem:[%s1137_s1 + $0x18] sm:$0xff] }
   0x6   :  { %475 = vmatpush.bf16.msra.mxu0 %v825_v3  ;;  %v839_v13 = vld [vmem:[%s1137_s1 + $0xa0] sm:$0xff]  ;;  %v24_v16 = vld [vmem:[%s1136_s0 + $0xe] sm:$0xff]  ;;  %v830_v20 = vld [vmem:[%s1137_s1 + $0x58] sm:$0xff] }
   0x7   :  { %488 = vmatpush.bf16.msra.mxu1 %v833_v4  ;;  %v22_v15 = vld [vmem:[%s1136_s0] sm:$0xff]  ;;  %v28_v18 = vld [vmem:[%s1136_s0 + $0x2a] sm:$0xff]  ;;  %40 = vst [vmem:[#allocation1 + $0x1] ss:$4 sm:$0xff] %v24_v16  ;;  %v838_v21 = vld [vmem:[%s1137_s1 + $0x98] sm:$0xff] }
   0x8   :  { %501 = vmatpush.bf16.msra.mxu2 %v841_v5  ;;  %v26_v17 = vld [vmem:[%s1136_s0 + $0x1c] sm:$0xff]  ;;  %38 = vst [vmem:[#allocation1] ss:$4 sm:$0xff] %v22_v15  ;;  %v821_v23 = vld [vmem:[%s1137_s1 + $0x10] sm:$0xff]  ;;  %v23_v24 = vld [vmem:[%s1136_s0 + $0x8] sm:$0x3f] }
   0x9   :  { %514 = vmatpush.bf16.msra.mxu3 %v849_v10  ;;  %42 = vst [vmem:[#allocation1 + $0x2] ss:$4 sm:$0xff] %v26_v17  ;;  %v847_v22 = vld [vmem:[%s1137_s1 + $0xe0] sm:$0xff]  ;;  %v25_v25 = vld [vmem:[%s1136_s0 + $0x16] sm:$0x3f]  ;;  %v820_v31 = vld [vmem:[%s1137_s1 + $0x8] sm:$0xff] }
   0xa   :  { %476 = vmatpush.bf16.msra.mxu0 %v824_v7  ;;  %44 = vst [vmem:[#allocation1 + $0x3] ss:$4 sm:$0xff] %v28_v18  ;;  %v829_v26 = vld [vmem:[%s1137_s1 + $0x50] sm:$0xff]  ;;  %v27_v27 = vld [vmem:[%s1136_s0 + $0x24] sm:$0x3f]  ;;  %v846_v30 = vld [vmem:[%s1137_s1 + $0xd8] sm:$0xff] }
   0xb   :  { %489 = vmatpush.bf16.msra.mxu1 %v832_v8  ;;  %v29_v28 = vld [vmem:[%s1136_s0 + $0x32] sm:$0x3f]  ;;  %46 = vst [vmem:[#allocation1 + $0x20] ss:$4 sm:$0xff] %v23_v24  ;;  %v828_v32 = vld [vmem:[%s1137_s1 + $0x48] sm:$0xff]  ;;  %v819_v35 = vld [vmem:[%s1137_s1] sm:$0xff] }
   0xc   :  { %502 = vmatpush.bf16.msra.mxu2 %v840_v9  ;;  %v837_v29 = vld [vmem:[%s1137_s1 + $0x90] sm:$0xff]  ;;  %48 = vst [vmem:[#allocation1 + $0x21] ss:$4 sm:$0xff] %v25_v25  ;;  %v836_v33 = vld [vmem:[%s1137_s1 + $0x88] sm:$0xff]  ;;  %v827_v36 = vld [vmem:[%s1137_s1 + $0x40] sm:$0xff] }
   0xd   :  { %515 = vmatpush.bf16.msra.mxu3 %v848_v14  ;;  %50 = vst [vmem:[#allocation1 + $0x22] ss:$4 sm:$0xff] %v27_v27  ;;  %v845_v34 = vld [vmem:[%s1137_s1 + $0xd0] sm:$0xff]  ;;  %v858_v39 = vld [vmem:[%s1137_s1 + $0x138] sm:$0xff]  ;;  %v835_v41 = vld [vmem:[%s1137_s1 + $0x80] sm:$0xff] }
   0xe   :  { %477 = vmatpush.bf16.msra.mxu0 %v823_v11  ;;  %52 = vst [vmem:[#allocation1 + $0x23] ss:$4 sm:$0xff] %v29_v28  ;;  %v866_v40 = vld [vmem:[%s1137_s1 + $0x178] sm:$0xff]  ;;  %v844_v42 = vld [vmem:[%s1137_s1 + $0xc8] sm:$0xff]  ;;  %v867_v46 = vld [vmem:[%s1137_s1 + $0x180] sm:$0xff] }
   0xf   :  { %490 = vmatpush.bf16.msra.mxu1 %v831_v12  ;;  %v857_v47 = vld [vmem:[%s1137_s1 + $0x130] sm:$0xff]  ;;  %v843_v50 = vld [vmem:[%s1137_s1 + $0xc0] sm:$0xff]  ;;  %v856_v52 = vld [vmem:[%s1137_s1 + $0x128] sm:$0xff] }
  0x10   :  { %503 = vmatpush.bf16.msra.mxu2 %v839_v13  ;;  %v865_v48 = vld [vmem:[%s1137_s1 + $0x170] sm:$0xff]  ;;  %v864_v53 = vld [vmem:[%s1137_s1 + $0x168] sm:$0xff]  ;;  %v855_v55 = vld [vmem:[%s1137_s1 + $0x120] sm:$0xff] }
  0x11   :  { %516 = vmatpush.bf16.msra.mxu3 %v847_v22  ;;  %v53_v37 = vld.sshfl [vmem:[#allocation1] sm:$0xff pattern:$0x73625140]  ;;  %v54_v38 = vld.sshfl [vmem:[#allocation1 + $0x8] sm:$0xff pattern:$0x73625140] }
  0x12   :  { %478 = vmatpush.bf16.msra.mxu0 %v822_v19  ;;  %v55_v43 = vld.sshfl [vmem:[#allocation1 + $0x10] sm:$0xff pattern:$0x73625140]  ;;  %v67_v44 = vpack.c.bf16 %v53_v37, %v53_v37  ;;  %v68_v45 = vpack.c.bf16 %v54_v38, %v54_v38  ;;  %v56_v51 = vld.sshfl [vmem:[#allocation1 + $0x18] sm:$0xff pattern:$0x73625140] }
  0x13   :  { %491 = vmatpush.bf16.msra.mxu1 %v830_v20  ;;  %v69_v49 = vpack.c.bf16 %v55_v43, %v55_v43  ;;  %v70_v54 = vpack.c.bf16 %v56_v51, %v56_v51  ;;  %v863_v56 = vld [vmem:[%s1137_s1 + $0x160] sm:$0xff]  ;;  %v854_v57 = vld [vmem:[%s1137_s1 + $0x118] sm:$0xff]  ;;  %v853_v60 = vld [vmem:[%s1137_s1 + $0x110] sm:$0xff] }
  0x14   :  { %504 = vmatpush.bf16.msra.mxu2 %v838_v21  ;;  %v862_v58 = vld [vmem:[%s1137_s1 + $0x158] sm:$0xff]  ;;  %v861_v61 = vld [vmem:[%s1137_s1 + $0x150] sm:$0xff]  ;;  %v852_v63 = vld [vmem:[%s1137_s1 + $0x108] sm:$0xff] }
  0x15   :  { %517 = vmatpush.bf16.msra.mxu3 %v846_v30  ;;  %v59_v59 = vld.sshfl [vmem:[#allocation1 + $0x30] sm:$0xff pattern:$0x73625140]  ;;  %v860_v0 = vld [vmem:[%s1137_s1 + $0x148] sm:$0xff]  ;;  %v851_v1 = vld [vmem:[%s1137_s1 + $0x100] sm:$0xff] }
  0x16   :  { %479 = vmatpush.bf16.msra.mxu0 %v821_v23  ;;  %v73_v62 = vpack.c.bf16 %v59_v59, %v59_v59  ;;  %v859_v2 = vld [vmem:[%s1137_s1 + $0x140] sm:$0xff]  ;;  %v58_v4 = vld.sshfl [vmem:[#allocation1 + $0x28] sm:$0xff pattern:$0x73625140]  ;;  %v573_v7 = vld [vmem:[%s1139_s3 + $0x38] sm:$0xff] }
  0x17   :  { %492 = vmatpush.bf16.msra.mxu1 %v829_v26  ;;  %v57_v3 = vld.sshfl [vmem:[#allocation1 + $0x20] sm:$0xff pattern:$0x73625140]  ;;  %v72_v6 = vpack.c.bf16 %v58_v4, %v58_v4  ;;  %v572_v8 = vld [vmem:[%s1139_s3 + $0x30] sm:$0xff]  ;;  %v571_v9 = vld [vmem:[%s1139_s3 + $0x28] sm:$0xff] }
  0x18   :  { %505 = vmatpush.bf16.msra.mxu2 %v837_v29  ;;  %v71_v5 = vpack.c.bf16 %v57_v3, %v57_v3  ;;  %v570_v10 = vld [vmem:[%s1139_s3 + $0x20] sm:$0xff]  ;;  %v569_v11 = vld [vmem:[%s1139_s3 + $0x18] sm:$0xff]  ;;  %v568_v14 = vld [vmem:[%s1139_s3 + $0x10] sm:$0xff] }
  0x19   :  { %518 = vmatpush.bf16.msra.mxu3 %v845_v34  ;;  %v567_v15 = vld [vmem:[%s1139_s3 + $0x8] sm:$0xff]  ;;  %v566_v16 = vld [vmem:[%s1139_s3] sm:$0xff] }
  0x1a   :  { %480 = vmatpush.bf16.msra.mxu0 %v820_v31  ;;  %v871_v20 = vld [vmem:[%s1138_s2] ss:$0 sm:$0xff] }
  0x1b   :  { %493 = vmatpush.bf16.msra.mxu1 %v828_v32  ;;  %v872_v38 = vld [vmem:[%s1140_s4] ss:$0 sm:$0xff] }
  0x1c   :  { %506 = vmatpush.bf16.msra.mxu2 %v836_v33 }
  0x1d   :  { %519 = vmatpush.bf16.msra.mxu3 %v844_v42 }
  0x1e   :  { %481 = vmatpush.bf16.msra.mxu0 %v819_v35 }
  0x1f   :  { %494 = vmatpush.bf16.msra.mxu1 %v827_v36 }
  0x20   :  { %507 = vmatpush.bf16.msra.mxu2 %v835_v41 }
  0x21   :  { %482 = vmatmul.bf16.vlgmr.msra.gmra.mxu0 %v67_v44  ;;  %520 = vmatpush.bf16.msra.mxu3 %v843_v50 }
  0x22   :  { %526 = vmatpush.bf16.msrb.mxu0 %v858_v39  ;;  %495 = vmatmul.bf16.vlgmr.msra.gmra.mxu1 %v68_v45 }
  0x23   :  { %539 = vmatpush.bf16.msrb.mxu1 %v866_v40  ;;  %508 = vmatmul.bf16.vlgmr.msra.gmra.mxu2 %v69_v49 }
  0x24   :  { %559 = vmatpush.bf16.msrb.mxu2 %v867_v46  ;;  %521 = vmatmul.bf16.vlgmr.msra.gmra.mxu3 %v70_v54 }
  0x25   :  { %590 = vmatpush.msrb.mxu3 %v573_v7 }
  0x26   :  { %527 = vmatpush.bf16.msrb.mxu0 %v857_v47 }
  0x27   :  { %540 = vmatpush.bf16.msrb.mxu1 %v865_v48  ;;  %591 = vmatpush.msrb.mxu3 %v572_v8 }
  0x29   :  { %592 = vmatpush.msrb.mxu3 %v571_v9 }
  0x2a   :  { %528 = vmatpush.bf16.msrb.mxu0 %v856_v52 }
  0x2b   :  { %541 = vmatpush.bf16.msrb.mxu1 %v864_v53  ;;  %593 = vmatpush.msrb.mxu3 %v570_v10 }
  0x2d   :  { %594 = vmatpush.msrb.mxu3 %v569_v11 }
  0x2e   :  { %529 = vmatpush.bf16.msrb.mxu0 %v855_v55 }
  0x2f   :  { %542 = vmatpush.bf16.msrb.mxu1 %v863_v56  ;;  %595 = vmatpush.msrb.mxu3 %v568_v14 }
  0x31   :  { %596 = vmatpush.msrb.mxu3 %v567_v15 }
  0x32   :  { %530 = vmatpush.bf16.msrb.mxu0 %v854_v57 }
  0x33   :  { %543 = vmatpush.bf16.msrb.mxu1 %v862_v58  ;;  %817 = vmatmul.msk.bf16.vlgmr.msrb.gmra.mxu2 %vm470_vm0, %v73_v62 }
  0x34   :  { %597 = vmatpush.msrb.mxu3 %v566_v16 }
  0x36   :  { %531 = vmatpush.bf16.msrb.mxu0 %v853_v60 }
  0x37   :  { %544 = vmatpush.bf16.msrb.mxu1 %v861_v61 }
  0x3a   :  { %532 = vmatpush.bf16.msrb.mxu0 %v852_v63 }
  0x3b   :  { %545 = vmatpush.bf16.msrb.mxu1 %v860_v0 }
  0x3e   :  { %533 = vmatpush.bf16.msrb.mxu0 %v851_v1 }
  0x3f   :  { %546 = vmatpush.bf16.msrb.mxu1 %v859_v2 }
  0x41   :  { %534 = vmatmul.bf16.vlgmr.msrb.gmra.mxu0 %v71_v5 }
  0x42   :  { %547 = vmatmul.bf16.vlgmr.msrb.gmra.mxu1 %v72_v6 }
  0x9e   :  { %v483_v12 = vpop.f32.mrf.mxu0 }
  0x9f   :  { %v496_v13 = vpop.f32.mrf.mxu1  ;;  %v484_v22 = vadd.f32 %v871_v20, %v483_v12 }
  0xa1   :  { %v497_v24 = vadd.f32 %v496_v13, %v484_v22 }
  0xa6   :  { %v485_v17 = vpop.f32.mrf.mxu0  ;;  %v509_v19 = vpop.f32.mrf.mxu2 }
  0xa7   :  { %v498_v18 = vpop.f32.mrf.mxu1  ;;  %v522_v21 = vpop.f32.mrf.mxu3  ;;  %v510_v26 = vadd.f32 %v509_v19, %v497_v24 }
  0xa9   :  { %v523_v28 = vadd.f32 %v522_v21, %v510_v26 }
  0xae   :  { %v511_v23 = vpop.f32.mrf.mxu2 }
  0xaf   :  { %v524_v25 = vpop.f32.mrf.mxu3 }
  0xb6   :  { %v561_v27 = vpop.f32.mrf.mxu2 }
  0xbe   :  { %v535_v29 = vpop.f32.mrf.mxu0  ;;  %v563_v33 = vpop.f32.mrf.mxu2 }
  0xbf   :  { %v548_v30 = vpop.f32.mrf.mxu1  ;;  %v536_v31 = vadd.f32 %v535_v29, %v523_v28 }
  0xc1   :  { %v549_v32 = vadd.f32 %v548_v30, %v536_v31 }
  0xc3   :  { %v562_v34 = vadd.f32 %v561_v27, %v549_v32 }
  0xc5   :  { %v565_v35 = vmax.f32 %v562_v34, 0.0 }
  0xc6   :  { %v537_v36 = vpop.f32.mrf.mxu0 }
  0xc7   :  { %v550_v37 = vpop.f32.mrf.mxu1  ;;  %818 = vmatmul.msk.f32.vlgmr.msrb.gmra.mxu3 %vm578_vm1, %v565_v35 }
 0x14a   :  { %v599_v39 = vpop.f32.mrf.mxu3 }
 0x14b   :  { %v600_v40 = vadd.f32 %v872_v38, %v599_v39 }
 0x14d   :  { %602 = vst [vmem:[#allocation2] sm:$0xff] %v600_v40 }
 0x14e   :  { %606 = vsyncadd [#allocation3], 96  ;;  %s609_s23 = sshll.u32 %s1141_s5, 4  ;;  %s899_s24 = smov [#allocation2]   ;;  %s610_s23 = int_to_ptr.hbm [resolvable:$true] %s609_s23 }
 0x14f   :  { %s607_s25 = sshll.u32 %s899_s24, 4  ;;  %s900_s26 = smov 32   ;;  %s608_s25 = int_to_ptr.vmem [resolvable:$true] %s607_s25 }
 0x150   :  { %s901_s27 = smov 2  }
 0x151   :  { %615 = dma.vmem_to_hbm [thread:$0]  %s608_s25, 32, %s610_s23, [#allocation3], %s900_s26, %s900_s26, %s901_s27  }
 0x152   :  { %897 = dma.done.wait [#allocation3], 128  }
 0x153   :  { %898 = vsyncadd [#allocation3], 4294967168 }
 0x154   :  { %620 = vsyncpa [#allocation3], 1 }

</bundles_post_ra>
